<compile_context>
chip_gen: v7x
topology: tpu7x:2x2x1
jax: 0.10.0
libtpu: 0.0.40
codegen_flags: <defaults>
</compile_context>

<pallas_src>
import functools
import math

import jax
import jax.numpy as jnp
from jax.experimental import pallas as pl
from jax.experimental.pallas import tpu as pltpu

_LANES = 128


def _round_up(x, m):
    return -(-x // m) * m


# ---------------------------------------------------------------------------
# Pallas kernel.
#   in_ref : (2, TR, 128)      [0] = theta, [1] = phi
#   out_ref: (n_comp, TR, 128) components-major output block
# The (TR, 128) tile is walked in chunk_rows-row sub-chunks; each component is
# stored as soon as it is computed so per-chunk liveness stays in vregs.
# ---------------------------------------------------------------------------
def _rsh_kernel(in_ref, out_ref, *, max_degree, chunk_rows):
    tile_rows = in_ref.shape[1]
    n_chunks = tile_rows // chunk_rows
    out_dtype = out_ref.dtype

    @pl.loop(0, n_chunks)
    def _(c):
        r0 = pl.multiple_of(c * chunk_rows, chunk_rows)
        rows = pl.ds(r0, chunk_rows)
        th = in_ref[0, rows, :]
        ph = in_ref[1, rows, :]

        def put(k, v):
            out_ref[k, rows, :] = v.astype(out_dtype)

        # ---- l = 0 ----
        put(0, jnp.full(th.shape, 0.5, dtype=th.dtype))                      # Y0_0

        if max_degree >= 1:
            s_th = jnp.sin(th)
            c_th = jnp.cos(th)
            s_ph = jnp.sin(ph)
            c_ph = jnp.cos(ph)
            s_th_s_ph = s_th * s_ph
            s_th_c_ph = s_th * c_ph
            put(1, s_th_s_ph * 0.866025404)                                  # Y1n1
            put(2, c_th * 0.866025404)                                       # Y1_0
            put(3, s_th_c_ph * 0.866025404)                                  # Y1p1

        if max_degree >= 2:
            s_th2 = s_th * s_th
            c_th2 = c_th * c_th
            s_ph2 = s_ph * s_ph
            c_ph2 = c_ph * c_ph
            sc_ph = s_ph * c_ph
            cos2ph = c_ph2 - s_ph2            # cos(2*phi), analytically identical
            s_c_th = s_th * c_th
            put(4, s_th2 * sc_ph * 1.936491673)                              # Y2n2
            put(5, s_c_th * s_ph * 1.936491673)                              # Y2n1
            put(6, (2.0 * c_th2 - s_th2) * 0.559016994)                      # Y2_0
            put(7, s_c_th * c_ph * 1.936491673)                              # Y2p1
            put(8, s_th2 * cos2ph * 0.968245837)                             # Y2p2

        if max_degree >= 3:
            s_th3 = s_th2 * s_th
            c_th3 = c_th2 * c_th
            s_ph3 = s_ph2 * s_ph
            c_ph3 = c_ph2 * c_ph
            sin3f = 3.0 * c_ph2 * s_ph - s_ph3          # reused by l=4
            cos3f = c_ph3 - 3.0 * s_ph2 * c_ph          # reused by l=4
            f4c2ms2 = 4.0 * c_th2 - s_th2
            put(9, s_th3 * sin3f * 1.045825033)                              # Y3n3
            put(10, s_th2 * c_th * sc_ph * 5.123475383)                      # Y3n2
            put(11, s_th * f4c2ms2 * s_ph * 0.810092587)                     # Y3n1
            put(12, (2.0 * c_th3 - 3.0 * c_th * s_th2) * 0.661437828)        # Y3_0
            put(13, s_th * f4c2ms2 * c_ph * 0.810092587)                     # Y3p1
            put(14, c_th * s_th2 * cos2ph * 2.561737691)                     # Y3p2
            put(15, s_th3 * cos3f * 1.045825033)                             # Y3p3

        if max_degree >= 4:
            s_th4 = s_th2 * s_th2
            c_th4 = c_th2 * c_th2
            s_ph4 = s_ph2 * s_ph2
            c_ph4 = c_ph2 * c_ph2
            s_th3_c_th = s_th3 * c_th
            f7c2m1 = 7.0 * c_th2 - 1.0
            f7c2m3 = 7.0 * c_th2 - 3.0
            put(16, s_th4 * (sc_ph * cos2ph) * 4.437059837)                  # Y4n4
            put(17, s_th3_c_th * sin3f * 3.1374751)                          # Y4n3
            put(18, s_th2 * sc_ph * f7c2m1 * 1.677050983)                    # Y4n2
            put(19, s_c_th * s_ph * f7c2m3 * 1.185854123)                    # Y4n1
            put(20, (35.0 * c_th4 - 30.0 * c_th2 + 3.0) * 0.1875)            # Y4_0
            put(21, s_c_th * c_ph * f7c2m3 * 1.185854123)                    # Y4p1
            put(22, s_th2 * cos2ph * f7c2m1 * 0.838525492)                   # Y4p2
            put(23, s_th3_c_th * cos3f * 3.1374751)                          # Y4p3
            put(24, s_th4 * (c_ph4 - 6.0 * c_ph2 * s_ph2 + s_ph4)
                    * 1.109264959)                                           # Y4p4


def real_spherical_harmonics(theta, phi, *, max_degree=4, tile_rows=512,
                             chunk_rows=8, components_major=False,
                             out_dtype=None):
    """Pallas equivalent of RealSphericalHarmonics(max_degree).forward(theta, phi).

    theta, phi: f32 arrays of shape (N, 1) (any N).
    Returns (N, n_components) by default (same ordering as the PyTorch module,
    l=0..max_degree, m=-l..+l).  With components_major=True returns the
    (n_components, N) slab straight from the kernel (no relayout pass) — use
    this when the consumer contracts over the component axis.
    out_dtype (e.g. jnp.bfloat16) is opt-in; compute stays f32, cast at store.
    """
    if max_degree >= 5:
        raise NotImplementedError(f"max_degree = {max_degree} not implemented")
    if theta.ndim != 2 or theta.shape[1] != 1:
        raise ValueError(f"theta must be of shape (-1, 1); got {theta.shape}")
    if theta.shape != phi.shape:
        raise ValueError(
            f"theta/phi must be of the same shape; got {theta.shape} and {phi.shape}")

    n_comp = (max_degree + 1) ** 2
    n = theta.shape[0]
    in_dtype = theta.dtype
    out_dtype = jnp.dtype(in_dtype if out_dtype is None else out_dtype)

    # Sublane-aligned chunking / tiling.
    chunk_rows = _round_up(max(chunk_rows, 8), 8)
    tile_rows = _round_up(max(tile_rows, chunk_rows), chunk_rows)
    rows = max(_round_up(n, _LANES) // _LANES, 1)
    tr = tile_rows if rows >= tile_rows else _round_up(rows, chunk_rows)
    padded_rows = _round_up(rows, tr)
    padded_n = padded_rows * _LANES

    # Points onto the lane axis; single stacked (2, rows, 128) input.
    th_flat = jnp.pad(theta[:, 0], (0, padded_n - n))
    ph_flat = jnp.pad(phi[:, 0], (0, padded_n - n))
    stacked = jnp.stack(
        [th_flat.reshape(padded_rows, _LANES),
         ph_flat.reshape(padded_rows, _LANES)], axis=0)

    kernel = functools.partial(
        _rsh_kernel, max_degree=max_degree, chunk_rows=chunk_rows)

    # VMEM budget: double-buffered input + output blocks, plus headroom.
    in_block_bytes = 2 * tr * _LANES * jnp.dtype(in_dtype).itemsize
    out_block_bytes = n_comp * tr * _LANES * out_dtype.itemsize
    vmem_bytes = 2 * (in_block_bytes + out_block_bytes) + (4 << 20)
    vmem_bytes = int(min(max(vmem_bytes, 32 << 20), 48 << 20))

    out_cm = pl.pallas_call(
        kernel,
        out_shape=jax.ShapeDtypeStruct((n_comp, padded_rows, _LANES), out_dtype),
        grid_spec=pltpu.PrefetchScalarGridSpec(
            num_scalar_prefetch=0,
            grid=(padded_rows // tr,),
            in_specs=[pl.BlockSpec((2, tr, _LANES), lambda i: (0, i, 0))],
            out_specs=pl.BlockSpec((n_comp, tr, _LANES), lambda i: (0, i, 0)),
        ),
        compiler_params=pltpu.CompilerParams(
            dimension_semantics=("parallel",),
            vmem_limit_bytes=vmem_bytes,
        ),
    )(stacked)

    flat = out_cm.reshape(n_comp, padded_n)[:, :n]      # (n_comp, N)
    if components_major:
        return flat
    # TODO(synk): the (N, n_comp) relayout is an extra HBM pass; prefer
    # components_major=True when the consumer can take (n_comp, N) directly.
    return flat.T


# ---------------------------------------------------------------------------
# Pure-JAX reference (original formulas, including the literal cos(2*phi)).
# ---------------------------------------------------------------------------
def _reference(theta, phi, max_degree=4):
    sin, cos = jnp.sin, jnp.cos
    Y0_0 = lambda th, ph: jnp.ones_like(th) * 0.5
    Y1_0 = lambda th, ph: cos(th) * 0.866025404
    Y1n1 = lambda th, ph: sin(th) * sin(ph) * 0.866025404
    Y1p1 = lambda th, ph: sin(th) * cos(ph) * 0.866025404
    Y2_0 = lambda th, ph: (2 * cos(th) ** 2 - sin(th) ** 2) * 0.559016994
    Y2n1 = lambda th, ph: sin(th) * cos(th) * sin(ph) * 1.936491673
    Y2n2 = lambda th, ph: sin(th) ** 2 * sin(ph) * cos(ph) * 1.936491673
    Y2p1 = lambda th, ph: sin(th) * cos(th) * cos(ph) * 1.936491673
    Y2p2 = lambda th, ph: sin(th) ** 2 * cos(2 * ph) * 0.968245837
    Y3_0 = lambda th, ph: (2 * cos(th) ** 3 - 3 * cos(th) * sin(th) ** 2) * 0.661437828
    Y3n1 = lambda th, ph: sin(th) * (4 * cos(th) ** 2 - sin(th) ** 2) * sin(ph) * 0.810092587
    Y3n2 = lambda th, ph: sin(th) ** 2 * cos(th) * cos(ph) * sin(ph) * 5.123475383
    Y3n3 = lambda th, ph: sin(th) ** 3 * (3 * cos(ph) ** 2 * sin(ph) - sin(ph) ** 3) * 1.045825033
    Y3p1 = lambda th, ph: sin(th) * (4 * cos(th) ** 2 - sin(th) ** 2) * cos(ph) * 0.810092587
    Y3p2 = lambda th, ph: cos(th) * sin(th) ** 2 * cos(2 * ph) * 2.561737691
    Y3p3 = lambda th, ph: sin(th) ** 3 * (cos(ph) ** 3 - 3 * sin(ph) ** 2 * cos(ph)) * 1.045825033
    Y4_0 = lambda th, ph: (35 * cos(th) ** 4 - 30 * cos(th) ** 2 + 3) * 0.1875
    Y4n1 = lambda th, ph: sin(th) * cos(th) * sin(ph) * (7 * cos(th) ** 2 - 3) * 1.185854123
    Y4n2 = lambda th, ph: sin(th) ** 2 * (sin(ph) * cos(ph)) * (7 * cos(th) ** 2 - 1) * 1.677050983
    Y4n3 = lambda th, ph: sin(th) ** 3 * cos(th) * (3 * cos(ph) ** 2 * sin(ph) - sin(ph) ** 3) * 3.1374751
    Y4n4 = lambda th, ph: sin(th) ** 4 * (sin(ph) * cos(ph) * cos(2 * ph)) * 4.437059837
    Y4p1 = lambda th, ph: sin(th) * cos(th) * cos(ph) * (7 * cos(th) ** 2 - 3) * 1.185854123
    Y4p2 = lambda th, ph: sin(th) ** 2 * cos(2 * ph) * (7 * cos(th) ** 2 - 1) * 0.838525492
    Y4p3 = lambda th, ph: sin(th) ** 3 * cos(th) * (cos(ph) ** 3 - 3 * cos(ph) * sin(ph) ** 2) * 3.1374751
    Y4p4 = lambda th, ph: sin(th) ** 4 * (cos(ph) ** 4 - 6 * cos(ph) ** 2 * sin(ph) ** 2 + sin(ph) ** 4) * 1.109264959

    hs = []
    if max_degree >= 0:
        hs += [Y0_0]
    if max_degree >= 1:
        hs += [Y1n1, Y1_0, Y1p1]
    if max_degree >= 2:
        hs += [Y2n2, Y2n1, Y2_0, Y2p1, Y2p2]
    if max_degree >= 3:
        hs += [Y3n3, Y3n2, Y3n1, Y3_0, Y3p1, Y3p2, Y3p3]
    if max_degree >= 4:
        hs += [Y4n4, Y4n3, Y4n2, Y4n1, Y4_0, Y4p1, Y4p2, Y4p3, Y4p4]
    return jnp.concatenate([Y(theta, phi) for Y in hs], axis=1)


if __name__ == "__main__":
    key = jax.random.PRNGKey(0)
    k1, k2 = jax.random.split(key)

    # Small, non-multiple-of-128 N: exercises padding + slicing + single tile.
    N = 300
    theta = jax.random.uniform(k1, (N, 1), jnp.float32, 0.0, math.pi)
    phi = jax.random.uniform(k2, (N, 1), jnp.float32, 0.0, 2.0 * math.pi)

    out = jax.block_until_ready(real_spherical_harmonics(theta, phi, max_degree=4))
    ref = _reference(theta, phi, max_degree=4)
    assert out.shape == (N, 25), out.shape
    assert jnp.allclose(out, ref, atol=1e-5, rtol=1e-5), "mismatch vs reference (N=300)"

    # Components-major (no relayout) path.
    cm = jax.block_until_ready(
        real_spherical_harmonics(theta, phi, max_degree=4, components_major=True))
    assert cm.shape == (25, N), cm.shape
    assert jnp.allclose(cm.T, ref, atol=1e-5, rtol=1e-5), "mismatch (components-major)"

    # Larger N: exercises a multi-step grid (2+ tiles) and ragged tail padding.
    N2 = 2 * 512 * 128 + 13
    k3, k4 = jax.random.split(k2)
    theta2 = jax.random.uniform(k3, (N2, 1), jnp.float32, 0.0, math.pi)
    phi2 = jax.random.uniform(k4, (N2, 1), jnp.float32, 0.0, 2.0 * math.pi)
    out2 = jax.block_until_ready(real_spherical_harmonics(theta2, phi2, max_degree=4))
    ref2 = _reference(theta2, phi2, max_degree=4)
    assert out2.shape == (N2, 25), out2.shape
    assert jnp.allclose(out2, ref2, atol=1e-5, rtol=1e-5), "mismatch vs reference (multi-tile)"

    print("KERNEL_OK")
</pallas_src>

<mosaic_0001>
module attributes {stable_mosaic.version = 11 : i64} {
  func.func @_rsh_kernel(%arg0: i32, %arg1: memref<2x8x128xf32, #tpu.memory_space<vmem>>, %arg2: memref<25x8x128xf32, #tpu.memory_space<vmem>>) attributes {dimension_semantics = [#tpu.dimension_semantics<parallel>], iteration_bounds = array<i64: 1>, scalar_prefetch = 0 : i64, scratch_operands = 0 : i64, tpu.core_type = #tpu.core_type<tc>, window_params = [{transform_indices = @transform_0, window_bounds = array<i64: 2, 8, 128>}, {transform_indices = @transform_1, window_bounds = array<i64: 25, 8, 128>}]} {
    %c0_i32 = arith.constant 0 : i32
    %c1_i32 = arith.constant 1 : i32
    %0 = arith.muli %c0_i32, %c1_i32 : i32
    %c0_i32_0 = arith.constant 0 : i32
    %1 = arith.addi %c0_i32_0, %0 : i32
    %c8_i32 = arith.constant 8 : i32
    %2 = arith.muli %1, %c8_i32 : i32
    %3 = tpu.assume_multiple %2, 8 : i32
    %c0 = arith.constant 0 : index
    %4 = arith.index_cast %3 : i32 to index
    %c0_1 = arith.constant 0 : index
    %5 = vector.load %arg1[%c0, %4, %c0_1] : memref<2x8x128xf32, #tpu.memory_space<vmem>>, vector<1x8x128xf32>
    %6 = vector.shape_cast %5 : vector<1x8x128xf32> to vector<8x128xf32>
    %c1 = arith.constant 1 : index
    %7 = arith.index_cast %3 : i32 to index
    %c0_2 = arith.constant 0 : index
    %8 = vector.load %arg1[%c1, %7, %c0_2] : memref<2x8x128xf32, #tpu.memory_space<vmem>>, vector<1x8x128xf32>
    %9 = vector.shape_cast %8 : vector<1x8x128xf32> to vector<8x128xf32>
    %cst = arith.constant 5.000000e-01 : f32
    %10 = vector.broadcast %cst : f32 to vector<8x128xf32>
    %c0_3 = arith.constant 0 : index
    %11 = arith.index_cast %3 : i32 to index
    %c0_4 = arith.constant 0 : index
    %12 = vector.load %arg2[%c0_3, %11, %c0_4] : memref<25x8x128xf32, #tpu.memory_space<vmem>>, vector<1x8x128xf32>
    %13 = vector.shape_cast %12 : vector<1x8x128xf32> to vector<8x128xf32>
    %14 = vector.shape_cast %10 : vector<8x128xf32> to vector<1x8x128xf32>
    tpu.vector_store %arg2[%c0_3, %11, %c0_4], %14 {strides = array<i32>} : memref<25x8x128xf32, #tpu.memory_space<vmem>>, vector<1x8x128xf32>,
    %15 = math.sin %6 : vector<8x128xf32>
    %16 = math.cos %6 : vector<8x128xf32>
    %17 = math.sin %9 : vector<8x128xf32>
    %18 = math.cos %9 : vector<8x128xf32>
    %19 = arith.mulf %15, %17 : vector<8x128xf32>
    %20 = arith.mulf %15, %18 : vector<8x128xf32>
    %cst_5 = arith.constant 0.866025388 : f32
    %21 = vector.broadcast %cst_5 : f32 to vector<8x128xf32>
    %22 = arith.mulf %19, %21 : vector<8x128xf32>
    %c1_6 = arith.constant 1 : index
    %23 = arith.index_cast %3 : i32 to index
    %c0_7 = arith.constant 0 : index
    %24 = vector.load %arg2[%c1_6, %23, %c0_7] : memref<25x8x128xf32, #tpu.memory_space<vmem>>, vector<1x8x128xf32>
    %25 = vector.shape_cast %24 : vector<1x8x128xf32> to vector<8x128xf32>
    %26 = vector.shape_cast %22 : vector<8x128xf32> to vector<1x8x128xf32>
    tpu.vector_store %arg2[%c1_6, %23, %c0_7], %26 {strides = array<i32>} : memref<25x8x128xf32, #tpu.memory_space<vmem>>, vector<1x8x128xf32>,
    %cst_8 = arith.constant 0.866025388 : f32
    %27 = vector.broadcast %cst_8 : f32 to vector<8x128xf32>
    %28 = arith.mulf %16, %27 : vector<8x128xf32>
    %c2 = arith.constant 2 : index
    %29 = arith.index_cast %3 : i32 to index
    %c0_9 = arith.constant 0 : index
    %30 = vector.load %arg2[%c2, %29, %c0_9] : memref<25x8x128xf32, #tpu.memory_space<vmem>>, vector<1x8x128xf32>
    %31 = vector.shape_cast %30 : vector<1x8x128xf32> to vector<8x128xf32>
    %32 = vector.shape_cast %28 : vector<8x128xf32> to vector<1x8x128xf32>
    tpu.vector_store %arg2[%c2, %29, %c0_9], %32 {strides = array<i32>} : memref<25x8x128xf32, #tpu.memory_space<vmem>>, vector<1x8x128xf32>,
    %cst_10 = arith.constant 0.866025388 : f32
    %33 = vector.broadcast %cst_10 : f32 to vector<8x128xf32>
    %34 = arith.mulf %20, %33 : vector<8x128xf32>
    %c3 = arith.constant 3 : index
    %35 = arith.index_cast %3 : i32 to index
    %c0_11 = arith.constant 0 : index
    %36 = vector.load %arg2[%c3, %35, %c0_11] : memref<25x8x128xf32, #tpu.memory_space<vmem>>, vector<1x8x128xf32>
    %37 = vector.shape_cast %36 : vector<1x8x128xf32> to vector<8x128xf32>
    %38 = vector.shape_cast %34 : vector<8x128xf32> to vector<1x8x128xf32>
    tpu.vector_store %arg2[%c3, %35, %c0_11], %38 {strides = array<i32>} : memref<25x8x128xf32, #tpu.memory_space<vmem>>, vector<1x8x128xf32>,
    %39 = arith.mulf %15, %15 : vector<8x128xf32>
    %40 = arith.mulf %16, %16 : vector<8x128xf32>
    %41 = arith.mulf %17, %17 : vector<8x128xf32>
    %42 = arith.mulf %18, %18 : vector<8x128xf32>
    %43 = arith.mulf %17, %18 : vector<8x128xf32>
    %44 = arith.subf %42, %41 : vector<8x128xf32>
    %45 = arith.mulf %15, %16 : vector<8x128xf32>
    %46 = arith.mulf %39, %43 : vector<8x128xf32>
    %cst_12 = arith.constant 1.93649173 : f32
    %47 = vector.broadcast %cst_12 : f32 to vector<8x128xf32>
    %48 = arith.mulf %46, %47 : vector<8x128xf32>
    %c4 = arith.constant 4 : index
    %49 = arith.index_cast %3 : i32 to index
    %c0_13 = arith.constant 0 : index
    %50 = vector.load %arg2[%c4, %49, %c0_13] : memref<25x8x128xf32, #tpu.memory_space<vmem>>, vector<1x8x128xf32>
    %51 = vector.shape_cast %50 : vector<1x8x128xf32> to vector<8x128xf32>
    %52 = vector.shape_cast %48 : vector<8x128xf32> to vector<1x8x128xf32>
    tpu.vector_store %arg2[%c4, %49, %c0_13], %52 {strides = array<i32>} : memref<25x8x128xf32, #tpu.memory_space<vmem>>, vector<1x8x128xf32>,
    %53 = arith.mulf %45, %17 : vector<8x128xf32>
    %cst_14 = arith.constant 1.93649173 : f32
    %54 = vector.broadcast %cst_14 : f32 to vector<8x128xf32>
    %55 = arith.mulf %53, %54 : vector<8x128xf32>
    %c5 = arith.constant 5 : index
    %56 = arith.index_cast %3 : i32 to index
    %c0_15 = arith.constant 0 : index
    %57 = vector.load %arg2[%c5, %56, %c0_15] : memref<25x8x128xf32, #tpu.memory_space<vmem>>, vector<1x8x128xf32>
    %58 = vector.shape_cast %57 : vector<1x8x128xf32> to vector<8x128xf32>
    %59 = vector.shape_cast %55 : vector<8x128xf32> to vector<1x8x128xf32>
    tpu.vector_store %arg2[%c5, %56, %c0_15], %59 {strides = array<i32>} : memref<25x8x128xf32, #tpu.memory_space<vmem>>, vector<1x8x128xf32>,
    %cst_16 = arith.constant 2.000000e+00 : f32
    %60 = vector.broadcast %cst_16 : f32 to vector<8x128xf32>
    %61 = arith.mulf %60, %40 : vector<8x128xf32>
    %62 = arith.subf %61, %39 : vector<8x128xf32>
    %cst_17 = arith.constant 5.590170e-01 : f32
    %63 = vector.broadcast %cst_17 : f32 to vector<8x128xf32>
    %64 = arith.mulf %62, %63 : vector<8x128xf32>
    %c6 = arith.constant 6 : index
    %65 = arith.index_cast %3 : i32 to index
    %c0_18 = arith.constant 0 : index
    %66 = vector.load %arg2[%c6, %65, %c0_18] : memref<25x8x128xf32, #tpu.memory_space<vmem>>, vector<1x8x128xf32>
    %67 = vector.shape_cast %66 : vector<1x8x128xf32> to vector<8x128xf32>
    %68 = vector.shape_cast %64 : vector<8x128xf32> to vector<1x8x128xf32>
    tpu.vector_store %arg2[%c6, %65, %c0_18], %68 {strides = array<i32>} : memref<25x8x128xf32, #tpu.memory_space<vmem>>, vector<1x8x128xf32>,
    %69 = arith.mulf %45, %18 : vector<8x128xf32>
    %cst_19 = arith.constant 1.93649173 : f32
    %70 = vector.broadcast %cst_19 : f32 to vector<8x128xf32>
    %71 = arith.mulf %69, %70 : vector<8x128xf32>
    %c7 = arith.constant 7 : index
    %72 = arith.index_cast %3 : i32 to index
    %c0_20 = arith.constant 0 : index
    %73 = vector.load %arg2[%c7, %72, %c0_20] : memref<25x8x128xf32, #tpu.memory_space<vmem>>, vector<1x8x128xf32>
    %74 = vector.shape_cast %73 : vector<1x8x128xf32> to vector<8x128xf32>
    %75 = vector.shape_cast %71 : vector<8x128xf32> to vector<1x8x128xf32>
    tpu.vector_store %arg2[%c7, %72, %c0_20], %75 {strides = array<i32>} : memref<25x8x128xf32, #tpu.memory_space<vmem>>, vector<1x8x128xf32>,
    %76 = arith.mulf %39, %44 : vector<8x128xf32>
    %cst_21 = arith.constant 0.968245863 : f32
    %77 = vector.broadcast %cst_21 : f32 to vector<8x128xf32>
    %78 = arith.mulf %76, %77 : vector<8x128xf32>
    %c8 = arith.constant 8 : index
    %79 = arith.index_cast %3 : i32 to index
    %c0_22 = arith.constant 0 : index
    %80 = vector.load %arg2[%c8, %79, %c0_22] : memref<25x8x128xf32, #tpu.memory_space<vmem>>, vector<1x8x128xf32>
    %81 = vector.shape_cast %80 : vector<1x8x128xf32> to vector<8x128xf32>
    %82 = vector.shape_cast %78 : vector<8x128xf32> to vector<1x8x128xf32>
    tpu.vector_store %arg2[%c8, %79, %c0_22], %82 {strides = array<i32>} : memref<25x8x128xf32, #tpu.memory_space<vmem>>, vector<1x8x128xf32>,
    %83 = arith.mulf %39, %15 : vector<8x128xf32>
    %84 = arith.mulf %40, %16 : vector<8x128xf32>
    %85 = arith.mulf %41, %17 : vector<8x128xf32>
    %86 = arith.mulf %42, %18 : vector<8x128xf32>
    %cst_23 = arith.constant 3.000000e+00 : f32
    %87 = vector.broadcast %cst_23 : f32 to vector<8x128xf32>
    %88 = arith.mulf %87, %42 : vector<8x128xf32>
    %89 = arith.mulf %88, %17 : vector<8x128xf32>
    %90 = arith.subf %89, %85 : vector<8x128xf32>
    %cst_24 = arith.constant 3.000000e+00 : f32
    %91 = vector.broadcast %cst_24 : f32 to vector<8x128xf32>
    %92 = arith.mulf %91, %41 : vector<8x128xf32>
    %93 = arith.mulf %92, %18 : vector<8x128xf32>
    %94 = arith.subf %86, %93 : vector<8x128xf32>
    %cst_25 = arith.constant 4.000000e+00 : f32
    %95 = vector.broadcast %cst_25 : f32 to vector<8x128xf32>
    %96 = arith.mulf %95, %40 : vector<8x128xf32>
    %97 = arith.subf %96, %39 : vector<8x128xf32>
    %98 = arith.mulf %83, %90 : vector<8x128xf32>
    %cst_26 = arith.constant 1.045825 : f32
    %99 = vector.broadcast %cst_26 : f32 to vector<8x128xf32>
    %100 = arith.mulf %98, %99 : vector<8x128xf32>
    %c9 = arith.constant 9 : index
    %101 = arith.index_cast %3 : i32 to index
    %c0_27 = arith.constant 0 : index
    %102 = vector.load %arg2[%c9, %101, %c0_27] : memref<25x8x128xf32, #tpu.memory_space<vmem>>, vector<1x8x128xf32>
    %103 = vector.shape_cast %102 : vector<1x8x128xf32> to vector<8x128xf32>
    %104 = vector.shape_cast %100 : vector<8x128xf32> to vector<1x8x128xf32>
    tpu.vector_store %arg2[%c9, %101, %c0_27], %104 {strides = array<i32>} : memref<25x8x128xf32, #tpu.memory_space<vmem>>, vector<1x8x128xf32>,
    %105 = arith.mulf %39, %16 : vector<8x128xf32>
    %106 = arith.mulf %105, %43 : vector<8x128xf32>
    %cst_28 = arith.constant 5.12347555 : f32
    %107 = vector.broadcast %cst_28 : f32 to vector<8x128xf32>
    %108 = arith.mulf %106, %107 : vector<8x128xf32>
    %c10 = arith.constant 10 : index
    %109 = arith.index_cast %3 : i32 to index
    %c0_29 = arith.constant 0 : index
    %110 = vector.load %arg2[%c10, %109, %c0_29] : memref<25x8x128xf32, #tpu.memory_space<vmem>>, vector<1x8x128xf32>
    %111 = vector.shape_cast %110 : vector<1x8x128xf32> to vector<8x128xf32>
    %112 = vector.shape_cast %108 : vector<8x128xf32> to vector<1x8x128xf32>
    tpu.vector_store %arg2[%c10, %109, %c0_29], %112 {strides = array<i32>} : memref<25x8x128xf32, #tpu.memory_space<vmem>>, vector<1x8x128xf32>,
    %113 = arith.mulf %15, %97 : vector<8x128xf32>
    %114 = arith.mulf %113, %17 : vector<8x128xf32>
    %cst_30 = arith.constant 0.810092568 : f32
    %115 = vector.broadcast %cst_30 : f32 to vector<8x128xf32>
    %116 = arith.mulf %114, %115 : vector<8x128xf32>
    %c11 = arith.constant 11 : index
    %117 = arith.index_cast %3 : i32 to index
    %c0_31 = arith.constant 0 : index
    %118 = vector.load %arg2[%c11, %117, %c0_31] : memref<25x8x128xf32, #tpu.memory_space<vmem>>, vector<1x8x128xf32>
    %119 = vector.shape_cast %118 : vector<1x8x128xf32> to vector<8x128xf32>
    %120 = vector.shape_cast %116 : vector<8x128xf32> to vector<1x8x128xf32>
    tpu.vector_store %arg2[%c11, %117, %c0_31], %120 {strides = array<i32>} : memref<25x8x128xf32, #tpu.memory_space<vmem>>, vector<1x8x128xf32>,
    %cst_32 = arith.constant 2.000000e+00 : f32
    %121 = vector.broadcast %cst_32 : f32 to vector<8x128xf32>
    %122 = arith.mulf %121, %84 : vector<8x128xf32>
    %cst_33 = arith.constant 3.000000e+00 : f32
    %123 = vector.broadcast %cst_33 : f32 to vector<8x128xf32>
    %124 = arith.mulf %123, %16 : vector<8x128xf32>
    %125 = arith.mulf %124, %39 : vector<8x128xf32>
    %126 = arith.subf %122, %125 : vector<8x128xf32>
    %cst_34 = arith.constant 0.661437809 : f32
    %127 = vector.broadcast %cst_34 : f32 to vector<8x128xf32>
    %128 = arith.mulf %126, %127 : vector<8x128xf32>
    %c12 = arith.constant 12 : index
    %129 = arith.index_cast %3 : i32 to index
    %c0_35 = arith.constant 0 : index
    %130 = vector.load %arg2[%c12, %129, %c0_35] : memref<25x8x128xf32, #tpu.memory_space<vmem>>, vector<1x8x128xf32>
    %131 = vector.shape_cast %130 : vector<1x8x128xf32> to vector<8x128xf32>
    %132 = vector.shape_cast %128 : vector<8x128xf32> to vector<1x8x128xf32>
    tpu.vector_store %arg2[%c12, %129, %c0_35], %132 {strides = array<i32>} : memref<25x8x128xf32, #tpu.memory_space<vmem>>, vector<1x8x128xf32>,
    %133 = arith.mulf %15, %97 : vector<8x128xf32>
    %134 = arith.mulf %133, %18 : vector<8x128xf32>
    %cst_36 = arith.constant 0.810092568 : f32
    %135 = vector.broadcast %cst_36 : f32 to vector<8x128xf32>
    %136 = arith.mulf %134, %135 : vector<8x128xf32>
    %c13 = arith.constant 13 : index
    %137 = arith.index_cast %3 : i32 to index
    %c0_37 = arith.constant 0 : index
    %138 = vector.load %arg2[%c13, %137, %c0_37] : memref<25x8x128xf32, #tpu.memory_space<vmem>>, vector<1x8x128xf32>
    %139 = vector.shape_cast %138 : vector<1x8x128xf32> to vector<8x128xf32>
    %140 = vector.shape_cast %136 : vector<8x128xf32> to vector<1x8x128xf32>
    tpu.vector_store %arg2[%c13, %137, %c0_37], %140 {strides = array<i32>} : memref<25x8x128xf32, #tpu.memory_space<vmem>>, vector<1x8x128xf32>,
    %141 = arith.mulf %16, %39 : vector<8x128xf32>
    %142 = arith.mulf %141, %44 : vector<8x128xf32>
    %cst_38 = arith.constant 2.56173778 : f32
    %143 = vector.broadcast %cst_38 : f32 to vector<8x128xf32>
    %144 = arith.mulf %142, %143 : vector<8x128xf32>
    %c14 = arith.constant 14 : index
    %145 = arith.index_cast %3 : i32 to index
    %c0_39 = arith.constant 0 : index
    %146 = vector.load %arg2[%c14, %145, %c0_39] : memref<25x8x128xf32, #tpu.memory_space<vmem>>, vector<1x8x128xf32>
    %147 = vector.shape_cast %146 : vector<1x8x128xf32> to vector<8x128xf32>
    %148 = vector.shape_cast %144 : vector<8x128xf32> to vector<1x8x128xf32>
    tpu.vector_store %arg2[%c14, %145, %c0_39], %148 {strides = array<i32>} : memref<25x8x128xf32, #tpu.memory_space<vmem>>, vector<1x8x128xf32>,
    %149 = arith.mulf %83, %94 : vector<8x128xf32>
    %cst_40 = arith.constant 1.045825 : f32
    %150 = vector.broadcast %cst_40 : f32 to vector<8x128xf32>
    %151 = arith.mulf %149, %150 : vector<8x128xf32>
    %c15 = arith.constant 15 : index
    %152 = arith.index_cast %3 : i32 to index
    %c0_41 = arith.constant 0 : index
    %153 = vector.load %arg2[%c15, %152, %c0_41] : memref<25x8x128xf32, #tpu.memory_space<vmem>>, vector<1x8x128xf32>
    %154 = vector.shape_cast %153 : vector<1x8x128xf32> to vector<8x128xf32>
    %155 = vector.shape_cast %151 : vector<8x128xf32> to vector<1x8x128xf32>
    tpu.vector_store %arg2[%c15, %152, %c0_41], %155 {strides = array<i32>} : memref<25x8x128xf32, #tpu.memory_space<vmem>>, vector<1x8x128xf32>,
    %156 = arith.mulf %39, %39 : vector<8x128xf32>
    %157 = arith.mulf %40, %40 : vector<8x128xf32>
    %158 = arith.mulf %41, %41 : vector<8x128xf32>
    %159 = arith.mulf %42, %42 : vector<8x128xf32>
    %160 = arith.mulf %83, %16 : vector<8x128xf32>
    %cst_42 = arith.constant 7.000000e+00 : f32
    %161 = vector.broadcast %cst_42 : f32 to vector<8x128xf32>
    %162 = arith.mulf %161, %40 : vector<8x128xf32>
    %cst_43 = arith.constant 1.000000e+00 : f32
    %163 = vector.broadcast %cst_43 : f32 to vector<8x128xf32>
    %164 = arith.subf %162, %163 : vector<8x128xf32>
    %cst_44 = arith.constant 7.000000e+00 : f32
    %165 = vector.broadcast %cst_44 : f32 to vector<8x128xf32>
    %166 = arith.mulf %165, %40 : vector<8x128xf32>
    %cst_45 = arith.constant 3.000000e+00 : f32
    %167 = vector.broadcast %cst_45 : f32 to vector<8x128xf32>
    %168 = arith.subf %166, %167 : vector<8x128xf32>
    %169 = arith.mulf %43, %44 : vector<8x128xf32>
    %170 = arith.mulf %156, %169 : vector<8x128xf32>
    %cst_46 = arith.constant 4.437060e+00 : f32
    %171 = vector.broadcast %cst_46 : f32 to vector<8x128xf32>
    %172 = arith.mulf %170, %171 : vector<8x128xf32>
    %c16 = arith.constant 16 : index
    %173 = arith.index_cast %3 : i32 to index
    %c0_47 = arith.constant 0 : index
    %174 = vector.load %arg2[%c16, %173, %c0_47] : memref<25x8x128xf32, #tpu.memory_space<vmem>>, vector<1x8x128xf32>
    %175 = vector.shape_cast %174 : vector<1x8x128xf32> to vector<8x128xf32>
    %176 = vector.shape_cast %172 : vector<8x128xf32> to vector<1x8x128xf32>
    tpu.vector_store %arg2[%c16, %173, %c0_47], %176 {strides = array<i32>} : memref<25x8x128xf32, #tpu.memory_space<vmem>>, vector<1x8x128xf32>,
    %177 = arith.mulf %160, %90 : vector<8x128xf32>
    %cst_48 = arith.constant 3.13747501 : f32
    %178 = vector.broadcast %cst_48 : f32 to vector<8x128xf32>
    %179 = arith.mulf %177, %178 : vector<8x128xf32>
    %c17 = arith.constant 17 : index
    %180 = arith.index_cast %3 : i32 to index
    %c0_49 = arith.constant 0 : index
    %181 = vector.load %arg2[%c17, %180, %c0_49] : memref<25x8x128xf32, #tpu.memory_space<vmem>>, vector<1x8x128xf32>
    %182 = vector.shape_cast %181 : vector<1x8x128xf32> to vector<8x128xf32>
    %183 = vector.shape_cast %179 : vector<8x128xf32> to vector<1x8x128xf32>
    tpu.vector_store %arg2[%c17, %180, %c0_49], %183 {strides = array<i32>} : memref<25x8x128xf32, #tpu.memory_space<vmem>>, vector<1x8x128xf32>,
    %184 = arith.mulf %39, %43 : vector<8x128xf32>
    %185 = arith.mulf %184, %164 : vector<8x128xf32>
    %cst_50 = arith.constant 1.67705095 : f32
    %186 = vector.broadcast %cst_50 : f32 to vector<8x128xf32>
    %187 = arith.mulf %185, %186 : vector<8x128xf32>
    %c18 = arith.constant 18 : index
    %188 = arith.index_cast %3 : i32 to index
    %c0_51 = arith.constant 0 : index
    %189 = vector.load %arg2[%c18, %188, %c0_51] : memref<25x8x128xf32, #tpu.memory_space<vmem>>, vector<1x8x128xf32>
    %190 = vector.shape_cast %189 : vector<1x8x128xf32> to vector<8x128xf32>
    %191 = vector.shape_cast %187 : vector<8x128xf32> to vector<1x8x128xf32>
    tpu.vector_store %arg2[%c18, %188, %c0_51], %191 {strides = array<i32>} : memref<25x8x128xf32, #tpu.memory_space<vmem>>, vector<1x8x128xf32>,
    %192 = arith.mulf %45, %17 : vector<8x128xf32>
    %193 = arith.mulf %192, %168 : vector<8x128xf32>
    %cst_52 = arith.constant 1.18585408 : f32
    %194 = vector.broadcast %cst_52 : f32 to vector<8x128xf32>
    %195 = arith.mulf %193, %194 : vector<8x128xf32>
    %c19 = arith.constant 19 : index
    %196 = arith.index_cast %3 : i32 to index
    %c0_53 = arith.constant 0 : index
    %197 = vector.load %arg2[%c19, %196, %c0_53] : memref<25x8x128xf32, #tpu.memory_space<vmem>>, vector<1x8x128xf32>
    %198 = vector.shape_cast %197 : vector<1x8x128xf32> to vector<8x128xf32>
    %199 = vector.shape_cast %195 : vector<8x128xf32> to vector<1x8x128xf32>
    tpu.vector_store %arg2[%c19, %196, %c0_53], %199 {strides = array<i32>} : memref<25x8x128xf32, #tpu.memory_space<vmem>>, vector<1x8x128xf32>,
    %cst_54 = arith.constant 3.500000e+01 : f32
    %200 = vector.broadcast %cst_54 : f32 to vector<8x128xf32>
    %201 = arith.mulf %200, %157 : vector<8x128xf32>
    %cst_55 = arith.constant 3.000000e+01 : f32
    %202 = vector.broadcast %cst_55 : f32 to vector<8x128xf32>
    %203 = arith.mulf %202, %40 : vector<8x128xf32>
    %204 = arith.subf %201, %203 : vector<8x128xf32>
    %cst_56 = arith.constant 3.000000e+00 : f32
    %205 = vector.broadcast %cst_56 : f32 to vector<8x128xf32>
    %206 = arith.addf %204, %205 : vector<8x128xf32>
    %cst_57 = arith.constant 1.875000e-01 : f32
    %207 = vector.broadcast %cst_57 : f32 to vector<8x128xf32>
    %208 = arith.mulf %206, %207 : vector<8x128xf32>
    %c20 = arith.constant 20 : index
    %209 = arith.index_cast %3 : i32 to index
    %c0_58 = arith.constant 0 : index
    %210 = vector.load %arg2[%c20, %209, %c0_58] : memref<25x8x128xf32, #tpu.memory_space<vmem>>, vector<1x8x128xf32>
    %211 = vector.shape_cast %210 : vector<1x8x128xf32> to vector<8x128xf32>
    %212 = vector.shape_cast %208 : vector<8x128xf32> to vector<1x8x128xf32>
    tpu.vector_store %arg2[%c20, %209, %c0_58], %212 {strides = array<i32>} : memref<25x8x128xf32, #tpu.memory_space<vmem>>, vector<1x8x128xf32>,
    %213 = arith.mulf %45, %18 : vector<8x128xf32>
    %214 = arith.mulf %213, %168 : vector<8x128xf32>
    %cst_59 = arith.constant 1.18585408 : f32
    %215 = vector.broadcast %cst_59 : f32 to vector<8x128xf32>
    %216 = arith.mulf %214, %215 : vector<8x128xf32>
    %c21 = arith.constant 21 : index
    %217 = arith.index_cast %3 : i32 to index
    %c0_60 = arith.constant 0 : index
    %218 = vector.load %arg2[%c21, %217, %c0_60] : memref<25x8x128xf32, #tpu.memory_space<vmem>>, vector<1x8x128xf32>
    %219 = vector.shape_cast %218 : vector<1x8x128xf32> to vector<8x128xf32>
    %220 = vector.shape_cast %216 : vector<8x128xf32> to vector<1x8x128xf32>
    tpu.vector_store %arg2[%c21, %217, %c0_60], %220 {strides = array<i32>} : memref<25x8x128xf32, #tpu.memory_space<vmem>>, vector<1x8x128xf32>,
    %221 = arith.mulf %39, %44 : vector<8x128xf32>
    %222 = arith.mulf %221, %164 : vector<8x128xf32>
    %cst_61 = arith.constant 0.838525474 : f32
    %223 = vector.broadcast %cst_61 : f32 to vector<8x128xf32>
    %224 = arith.mulf %222, %223 : vector<8x128xf32>
    %c22 = arith.constant 22 : index
    %225 = arith.index_cast %3 : i32 to index
    %c0_62 = arith.constant 0 : index
    %226 = vector.load %arg2[%c22, %225, %c0_62] : memref<25x8x128xf32, #tpu.memory_space<vmem>>, vector<1x8x128xf32>
    %227 = vector.shape_cast %226 : vector<1x8x128xf32> to vector<8x128xf32>
    %228 = vector.shape_cast %224 : vector<8x128xf32> to vector<1x8x128xf32>
    tpu.vector_store %arg2[%c22, %225, %c0_62], %228 {strides = array<i32>} : memref<25x8x128xf32, #tpu.memory_space<vmem>>, vector<1x8x128xf32>,
    %229 = arith.mulf %160, %94 : vector<8x128xf32>
    %cst_63 = arith.constant 3.13747501 : f32
    %230 = vector.broadcast %cst_63 : f32 to vector<8x128xf32>
    %231 = arith.mulf %229, %230 : vector<8x128xf32>
    %c23 = arith.constant 23 : index
    %232 = arith.index_cast %3 : i32 to index
    %c0_64 = arith.constant 0 : index
    %233 = vector.load %arg2[%c23, %232, %c0_64] : memref<25x8x128xf32, #tpu.memory_space<vmem>>, vector<1x8x128xf32>
    %234 = vector.shape_cast %233 : vector<1x8x128xf32> to vector<8x128xf32>
    %235 = vector.shape_cast %231 : vector<8x128xf32> to vector<1x8x128xf32>
    tpu.vector_store %arg2[%c23, %232, %c0_64], %235 {strides = array<i32>} : memref<25x8x128xf32, #tpu.memory_space<vmem>>, vector<1x8x128xf32>,
    %cst_65 = arith.constant 6.000000e+00 : f32
    %236 = vector.broadcast %cst_65 : f32 to vector<8x128xf32>
    %237 = arith.mulf %236, %42 : vector<8x128xf32>
    %238 = arith.mulf %237, %41 : vector<8x128xf32>
    %239 = arith.subf %159, %238 : vector<8x128xf32>
    %240 = arith.addf %239, %158 : vector<8x128xf32>
    %241 = arith.mulf %156, %240 : vector<8x128xf32>
    %cst_66 = arith.constant 1.10926497 : f32
    %242 = vector.broadcast %cst_66 : f32 to vector<8x128xf32>
    %243 = arith.mulf %241, %242 : vector<8x128xf32>
    %c24 = arith.constant 24 : index
    %244 = arith.index_cast %3 : i32 to index
    %c0_67 = arith.constant 0 : index
    %245 = vector.load %arg2[%c24, %244, %c0_67] : memref<25x8x128xf32, #tpu.memory_space<vmem>>, vector<1x8x128xf32>
    %246 = vector.shape_cast %245 : vector<1x8x128xf32> to vector<8x128xf32>
    %247 = vector.shape_cast %243 : vector<8x128xf32> to vector<1x8x128xf32>
    tpu.vector_store %arg2[%c24, %244, %c0_67], %247 {strides = array<i32>} : memref<25x8x128xf32, #tpu.memory_space<vmem>>, vector<1x8x128xf32>,
    %c1_i32_68 = arith.constant 1 : i32
    return
  }
  func.func @transform_0(%arg0: i32) -> (i32, i32, i32) {
    %c0_i32 = arith.constant 0 : i32
    %c0_i32_0 = arith.constant 0 : i32
    %c0_i32_1 = arith.constant 0 : i32
    return %c0_i32, %arg0, %c0_i32_0 : i32, i32, i32
  }
  func.func @transform_1(%arg0: i32) -> (i32, i32, i32) {
    %c0_i32 = arith.constant 0 : i32
    %c0_i32_0 = arith.constant 0 : i32
    %c0_i32_1 = arith.constant 0 : i32
    return %c0_i32, %arg0, %c0_i32_0 : i32, i32, i32
  }
}

</mosaic_0001>

<bundles_post_ra>
// kernel: tpu_custom_call.1
= control target key start
LH: loop header
LB: loop body
LE: loop exit
PB: predicated region body
PF: predicated region fallthrough
CT: control target
= control target key end

     0   :  { %6 = vsyncpa [#allocation3], 0  ;;  %s920_s0 = inlined_call_operand.hbm [shape: f32[2,8,128], index: 0, kind: input, shape index: {}]   ;;  %s921_s1 = inlined_call_operand.hbm [shape: f32[25,8,128], index: 1, kind: output, shape index: {}]  }
   0x1   :  { %7 = vsyncpa [#allocation4], 0  ;;  %s736_s6 = smov [#allocation2]   ;;  %s688_s10 = scalar_lea.hbm %s920_s0, 256 }
   0x2   :  { %s13_s7 = sshll.u32 %s736_s6, 4  ;;  %p689_p0 = scmp.ne.s32.totalorder %s920_s0, %s688_s10  ;;  %s14_s7 = int_to_ptr.vmem [resolvable:$true] %s13_s7 }
   0x3   :  { %p692_p1 = scmp.lt.u32.totalorder %s688_s10, %s920_s0 }
   0x5   :  { %p694_p2 = pnand %p692_p1, %p689_p0 }
   0x7   :  { %697 = shalt.err (!%p694_p2)
}
   0x8   :  { %s698_s15 = scalar_lea.vmem %s14_s7, 256  ;;  %p703_p4 = scmp.lt.s32.totalorder %s14_s7, %s14_s7 }
   0x9   :  { %p699_p3 = scmp.ne.s32.totalorder %s14_s7, %s698_s15  ;;  %p704_p5 = scmp.lt.s32.totalorder %s698_s15, %s698_s15 }
   0xb   :  { %p705_p6 = por %p704_p5, %p703_p4 }
   0xd   :  { %p706_p7 = pnand %p705_p6, %p699_p3 }
   0xf   :  { %709 = shalt.err (!%p706_p7)
}
  0x10   :  { %s737_s16 = smov 128   ;;  %s738_s17 = smov 8  }
  0x11   :  { %19 = dma.hbm_to_vmem [thread:$0]  %s920_s0, 256, %s14_s7, [#allocation3], %s737_s16, %s737_s16, %s738_s17  }
  0x12   :  { %732 = dma.done.wait [#allocation3], 256  }
  0x13   :  { %733 = vsyncadd [#allocation3], 4294967040  ;;  %v739_v0 = vmov 0.5   ;;  %v772_v1 = vld [vmem:[#allocation2] sm:$0xff]  ;;  %v774_v2 = vld [vmem:[#allocation2 + $0x8] sm:$0xff]  ;;  %s746_s0 = smov [#allocation5]  }
  0x14   :  { %27 = vst [vmem:[#allocation5] sm:$0xff] %v739_v0  ;;  %v28_v3 = vand.u32 2147483647, %v772_v1  ;;  %v31_v4 = vand.u32 2139095040, %v772_v1  ;;  %v235_v5 = vand.u32 2147483647, %v774_v2 }
  0x15   :  { %v238_v6 = vand.u32 2139095040, %v774_v2  ;;  %v740_v25 = vmov 683565275   ;;  %v741_v27 = vmov 2475754826   ;;  %vm30_vm14 = vcmp.lt.s32.totalorder %v772_v1, 0 }
  0x16   :  { %v32_v7 = vshrl.u32 %v31_v4, 23  ;;  %v35_v8 = vand.u32 8388607, %v28_v3  ;;  %v242_v10 = vand.u32 8388607, %v235_v5  ;;  %s606_s20 = sshll.u32 %s746_s0, 4  ;;  %s607_s20 = int_to_ptr.vmem [resolvable:$true] %s606_s20 }
  0x17   :  { %v239_v9 = vshrl.u32 %v238_v6, 23  ;;  %v742_v29 = vmov 2131351028   ;;  %v743_v31 = vmov 2102212464   ;;  %s710_s21 = scalar_lea.vmem %s607_s20, 3200  ;;  %p715_p9 = scmp.lt.s32.totalorder %s607_s20, %s607_s20 }
  0x18   :  { %v643_v11 = vadd.s32 4294967169, %v32_v7  ;;  %v36_v14 = vor.u32 8388608, %v35_v8  ;;  %v243_v15 = vor.u32 8388608, %v242_v10  ;;  %v744_v33 = vmov 920167782   ;;  %p711_p8 = scmp.ne.s32.totalorder %s607_s20, %s710_s21  ;;  %p716_p10 = scmp.lt.s32.totalorder %s710_s21, %s710_s21 }
  0x19   :  { %v651_v12 = vadd.s32 4294967169, %v239_v9  ;;  %v745_v41 = vmov 1326507024   ;;  %vm29_vm15 = vcmp.le.f32.partialorder %v28_v3, 0.7853982 }
  0x1a   :  { %v38_v13 = vadd.s32 1, %v643_v11  ;;  %v784_v21 = vshll.u32 %v36_v14, 8  ;;  %v786_v23 = vshll.u32 %v243_v15, 8  ;;  %p717_p11 = por %p716_p10, %p715_p9 }
  0x1b   :  { %v245_v16 = vadd.s32 1, %v651_v12 }
  0x1c   :  { %vm39_vm0 = vcmp.gt.s32.totalorder %v38_v13, 0  ;;  %p718_p12 = pnand %p717_p11, %p711_p8 }
  0x1d   :  { %v40_v17 = vsel %vm39_vm0, %v38_v13, 0  ;;  %vm246_vm1 = vcmp.gt.s32.totalorder %v245_v16, 0  ;;  %vm237_vm0 = vcmp.lt.s32.totalorder %v774_v2, 0 }
  0x1e   :  { %v41_v18 = vshrl.u32 %v40_v17, 5  ;;  %v42_v19 = vand.u32 31, %v40_v17  ;;  %v247_v20 = vsel %vm246_vm1, %v245_v16, 0  ;;  %vm236_vm1 = vcmp.le.f32.partialorder %v235_v5, 0.7853982 }
  0x1f   :  { %v249_v22 = vand.u32 31, %v247_v20  ;;  %v788_v35 = vshrl.u32 %v247_v20, 5 }
  0x20   :  { %v43_v24 = vsub.s32 32, %v42_v19  ;;  %v45_v26 = vshll.u32 %v740_v25, %v42_v19  ;;  %v48_v28 = vshll.u32 %v741_v27, %v42_v19  ;;  %v51_v30 = vshll.u32 %v742_v29, %v42_v19 }
  0x21   :  { %v54_v32 = vshll.u32 %v743_v31, %v42_v19  ;;  %v57_v34 = vshll.u32 %v744_v33, %v42_v19  ;;  %vm60_vm2 = vcmp.lt.s32.totalorder %v41_v18, 1  ;;  %vm61_vm3 = vcmp.lt.s32.totalorder %v41_v18, 2 }
  0x22   :  { %v44_v36 = vshrl.u32 %v740_v25, %v43_v24  ;;  %v46_v37 = vshrl.u32 %v741_v27, %v43_v24  ;;  %v49_v38 = vshrl.u32 %v742_v29, %v43_v24  ;;  %v52_v39 = vshrl.u32 %v743_v31, %v43_v24 }
  0x23   :  { %v55_v40 = vshrl.u32 %v744_v33, %v43_v24  ;;  %v58_v42 = vshrl.u32 %v745_v41, %v43_v24  ;;  %vm63_vm4 = vcmp.lt.s32.totalorder %v41_v18, 4  ;;  %v250_v46 = vsub.s32 32, %v249_v22 }
  0x24   :  { %v47_v43 = vor.u32 %v46_v37, %v45_v26  ;;  %v50_v44 = vor.u32 %v49_v38, %v48_v28  ;;  %v53_v45 = vor.u32 %v52_v39, %v51_v30  ;;  %vm62_vm5 = vcmp.lt.s32.totalorder %v41_v18, 3 }
  0x25   :  { %v56_v47 = vor.u32 %v55_v40, %v54_v32  ;;  %v59_v48 = vor.u32 %v58_v42, %v57_v34  ;;  %v252_v49 = vshll.u32 %v740_v25, %v249_v22  ;;  %v255_v57 = vshll.u32 %v741_v27, %v249_v22 }
  0x26   :  { %v64_v50 = vsel %vm60_vm2, %v44_v36, %v47_v43  ;;  %v65_v51 = vsel %vm63_vm4, %v53_v45, 2102212464  ;;  %v68_v52 = vsel %vm60_vm2, %v47_v43, %v50_v44  ;;  %v72_v53 = vsel %vm60_vm2, %v50_v44, %v53_v45 }
  0x27   :  { %v66_v54 = vsel %vm62_vm5, %v50_v44, %v65_v51  ;;  %v69_v55 = vsel %vm63_vm4, %v56_v47, 920167782  ;;  %v73_v56 = vsel %vm63_vm4, %v59_v48, 1326507024  ;;  %v251_v60 = vshrl.u32 %v740_v25, %v250_v46 }
  0x28   :  { %v70_v58 = vsel %vm62_vm5, %v53_v45, %v69_v55  ;;  %v74_v59 = vsel %vm62_vm5, %v56_v47, %v73_v56  ;;  %v253_v61 = vshrl.u32 %v741_v27, %v250_v46  ;;  %v67_v62 = vsel %vm61_vm3, %v64_v50, %v66_v54 }
  0x29   :  { %v71_v63 = vsel %vm61_vm3, %v68_v52, %v70_v58  ;;  %v75_v0 = vsel %vm61_vm3, %v72_v53, %v74_v59  ;;  %v256_v4 = vshrl.u32 %v742_v29, %v250_v46  ;;  %v258_v12 = vshll.u32 %v742_v29, %v249_v22 }
  0x2a   :  { %v797_v6 = vmul.u32.u64.low %v784_v21, %v75_v0  ;;  %v798_v7 = vmul.u32.u64.high %v784_v21, %v75_v0, %v797_v6  ;;  %v801_v8 = vmul.u32.u64.low %v784_v21, %v71_v63  ;;  %v802_v9 = vmul.u32.u64.high %v784_v21, %v71_v63, %v801_v8 }
  0x2b   :  { %v254_v10 = vor.u32 %v253_v61, %v252_v49  ;;  %v257_v11 = vor.u32 %v256_v4, %v255_v57  ;;  %v259_v13 = vshrl.u32 %v743_v31, %v250_v46  ;;  %v261_v14 = vshll.u32 %v743_v31, %v249_v22 }
  0x2c   :  { %v262_v15 = vshrl.u32 %v744_v33, %v250_v46  ;;  %v264_v16 = vshll.u32 %v744_v33, %v249_v22  ;;  %v265_v17 = vshrl.u32 %v745_v41, %v250_v46  ;;  %v83_v18 = vmul.u32 %v784_v21, %v67_v62 }
  0x2d   :  { %v260_v19 = vor.u32 %v259_v13, %v258_v12  ;;  %vm267_vm6 = vcmp.lt.s32.totalorder %v788_v35, 1  ;;  %vm268_vm7 = vcmp.lt.s32.totalorder %v788_v35, 2  ;;  %vm85_vm8 = vc.u32 %v798_v7, %v801_v8 }
  0x2e   :  { %v86_v20 = vadd.s32 1, %v802_v9  ;;  %v263_v24 = vor.u32 %v262_v15, %v261_v14  ;;  %vm269_vm9 = vcmp.lt.s32.totalorder %v788_v35, 3  ;;  %v266_v25 = vor.u32 %v265_v17, %v264_v16 }
  0x2f   :  { %vm270_vm10 = vcmp.lt.s32.totalorder %v788_v35, 4  ;;  %v271_v26 = vsel %vm267_vm6, %v251_v60, %v254_v10  ;;  %v275_v22 = vsel %vm267_vm6, %v254_v10, %v257_v11  ;;  %v279_v29 = vsel %vm267_vm6, %v257_v11, %v260_v19 }
  0x30   :  { %v87_v27 = vsel %vm85_vm8, %v86_v20, %v802_v9  ;;  %v272_v21 = vsel %vm270_vm10, %v260_v19, 2102212464  ;;  %v276_v28 = vsel %vm270_vm10, %v263_v24, 920167782  ;;  %v280_v33 = vsel %vm270_vm10, %v266_v25, 1326507024 }
  0x31   :  { %v88_v30 = vadd.s32 %v87_v27, %v83_v18  ;;  %v273_v31 = vsel %vm269_vm9, %v257_v11, %v272_v21  ;;  %v277_v32 = vsel %vm269_vm9, %v260_v19, %v276_v28  ;;  %v281_v37 = vsel %vm269_vm9, %v263_v24, %v280_v33 }
  0x32   :  { %v274_v34 = vsel %vm268_vm7, %v271_v26, %v273_v31  ;;  %v278_v36 = vsel %vm268_vm7, %v275_v22, %v277_v32  ;;  %v282_v39 = vsel %vm268_vm7, %v279_v29, %v281_v37  ;;  %v84_v58 = vadd.s32 %v801_v8, %v798_v7 }
  0x33   :  { %v89_v38 = vadd.s32 536870912, %v88_v30  ;;  %v819_v40 = vmul.u32.u64.low %v786_v23, %v278_v36  ;;  %v820_v41 = vmul.u32.u64.high %v786_v23, %v278_v36, %v819_v40  ;;  %v290_v45 = vmul.u32 %v786_v23, %v274_v34 }
  0x34   :  { %v823_v42 = vmul.u32.u64.low %v786_v23, %v282_v39  ;;  %v824_v43 = vmul.u32.u64.high %v786_v23, %v282_v39, %v823_v42  ;;  %vm120_vm8 = vweird.f32 %v772_v1  ;;  %vm327_vm9 = vweird.f32 %v774_v2 }
  0x35   :  { %v90_v44 = vshrl.u32 %v89_v38, 30  ;;  %v293_v47 = vadd.s32 1, %v820_v41 }
  0x36   :  { %vm292_vm11 = vc.u32 %v824_v43, %v819_v40  ;;  %v291_v15 = vadd.s32 %v819_v40, %v824_v43 }
  0x37   :  { %v91_v46 = vshll.u32 %v90_v44, 30  ;;  %v294_v35 = vsel %vm292_vm11, %v293_v47, %v820_v41  ;;  %v114_v14 = vsub.s32 4, %v90_v44 }
  0x38   :  { %v295_v49 = vadd.s32 %v294_v35, %v290_v45 }
  0x39   :  { %v92_v48 = vsub.s32 %v88_v30, %v91_v46  ;;  %v115_v20 = vsel %vm30_vm14, %v114_v14, %v90_v44 }
  0x3a   :  { %v296_v51 = vadd.s32 536870912, %v295_v49  ;;  %v117_v28 = vsel %vm29_vm15, 0, %v115_v20 }
  0x3b   :  { %v94_v50 = vsub.s32 0, %v92_v48  ;;  %v121_v34 = vadd.s32 3, %v117_v28  ;;  %v225_v39 = vand.u32 3, %v117_v28 }
  0x3c   :  { %v297_v53 = vshrl.u32 %v296_v51, 30 }
  0x3d   :  { %v644_v52 = vmin.u32 %v94_v50, %v92_v48  ;;  %v122_v38 = vand.u32 3, %v121_v34  ;;  %vm230_vm3 = vcmp.eq.s32.totalorder %v225_v39, 2  ;;  %vm227_vm5 = vcmp.eq.s32.totalorder %v225_v39, 0 }
  0x3e   :  { %v298_v55 = vshll.u32 %v297_v53, 30  ;;  %v321_v32 = vsub.s32 4, %v297_v53  ;;  %vm226_vm7 = vcmp.lt.s32.totalorder %v225_v39, 2 }
  0x3f   :  { %v96_v54 = vclz %v644_v52  ;;  %vm127_vm2 = vcmp.eq.s32.totalorder %v122_v38, 2  ;;  %vm124_vm4 = vcmp.eq.s32.totalorder %v122_v38, 0  ;;  %vm123_vm6 = vcmp.lt.s32.totalorder %v122_v38, 2 }
  0x40   :  { %v299_v57 = vsub.s32 %v295_v49, %v298_v55  ;;  %v322_v37 = vsel %vm237_vm0, %v321_v32, %v297_v53 }
  0x41   :  { %v645_v56 = vadd.s32 4294967294, %v96_v54  ;;  %v324_v40 = vsel %vm236_vm1, 0, %v322_v37 }
  0x42   :  { %v301_v59 = vsub.s32 0, %v299_v57  ;;  %v328_v43 = vadd.s32 3, %v324_v40  ;;  %v432_v47 = vand.u32 3, %v324_v40 }
  0x43   :  { %vm646_vm12 = vcmp.lt.s32.totalorder %v645_v56, 0 }
  0x44   :  { %v99_v23 = vsel %vm646_vm12, 0, %v645_v56  ;;  %v652_v63 = vmin.u32 %v301_v59, %v299_v57  ;;  %v329_v49 = vand.u32 3, %v328_v43  ;;  %vm433_vm10 = vcmp.lt.s32.totalorder %v432_v47, 2 }
  0x45   :  { %v100_v60 = vsub.s32 32, %v99_v23  ;;  %v101_v61 = vshll.u32 %v92_v48, %v99_v23  ;;  %v104_v62 = vsub.s32 4294967266, %v99_v23  ;;  %vm434_vm11 = vcmp.eq.s32.totalorder %v432_v47, 0 }
  0x46   :  { %v303_v6 = vclz %v652_v63  ;;  %vm437_vm12 = vcmp.eq.s32.totalorder %v432_v47, 2 }
  0x47   :  { %v102_v0 = vshrl.u32 %v84_v58, %v100_v60  ;;  %v105_v4 = vadd.s32 127, %v104_v62 }
  0x48   :  { %v653_v11 = vadd.s32 4294967294, %v303_v6 }
  0x49   :  { %v103_v9 = vor.u32 %v102_v0, %v101_v61  ;;  %v106_v10 = vshll.u32 %v105_v4, 23 }
  0x4a   :  { %vm654_vm13 = vcmp.lt.s32.totalorder %v653_v11, 0 }
  0x4b   :  { %v107_v12 = vor.u32 4788187, %v106_v10  ;;  %v110_v13 = vcvt.s32.f32 %v103_v9  ;;  %v306_v8 = vsel %vm654_vm13, 0, %v653_v11  ;;  %vm330_vm13 = vcmp.lt.s32.totalorder %v329_v49, 2 }
  0x4c   :  { %v307_v16 = vsub.s32 32, %v306_v8  ;;  %v308_v17 = vshll.u32 %v299_v57, %v306_v8  ;;  %v311_v18 = vsub.s32 4294967266, %v306_v8 }
  0x4d   :  { %v108_v7 = vand.u32 2147483647, %v107_v12 }
  0x4e   :  { %v309_v24 = vshrl.u32 %v291_v15, %v307_v16  ;;  %v312_v25 = vadd.s32 127, %v311_v18 }
  0x4f   :  { %v111_v19 = vmul.f32 %v110_v13, %v108_v7 }
  0x50   :  { %v310_v22 = vor.u32 %v309_v24, %v308_v17  ;;  %v313_v27 = vshll.u32 %v312_v25, 23 }
  0x51   :  { %v112_v26 = vxor.u32 2147483648, %v111_v19 }
  0x52   :  { %v314_v30 = vor.u32 4788187, %v313_v27  ;;  %v317_v31 = vcvt.s32.f32 %v310_v22 }
  0x53   :  { %v113_v21 = vsel %vm30_vm14, %v112_v26, %v111_v19  ;;  %vm331_vm14 = vcmp.eq.s32.totalorder %v329_v49, 0 }
  0x54   :  { %v116_v29 = vsel %vm29_vm15, %v772_v1, %v113_v21  ;;  %v315_v33 = vand.u32 2147483647, %v314_v30  ;;  %vm334_vm15 = vcmp.eq.s32.totalorder %v329_v49, 2 }
  0x55   :  { %680 = vcosq.f32 %v116_v29 }
  0x56   :  { %682 = vsinq.f32 %v116_v29  ;;  %v318_v36 = vmul.f32 %v317_v31, %v315_v33 }
  0x58   :  { %v319_v3 = vxor.u32 2147483648, %v318_v36 }
  0x5a   :  { %v320_v41 = vsel %vm237_vm0, %v319_v3, %v318_v36 }
  0x5b   :  { %v323_v42 = vsel %vm236_vm1, %v774_v2, %v320_v41 }
  0x5c   :  { %684 = vcosq.f32 %v323_v42 }
  0x5d   :  { %686 = vsinq.f32 %v323_v42 }
  0x5f   :  { %v681_v44 = vpop.eup %680 }
  0x60   :  { %v683_v45 = vpop.eup %682  ;;  %v128_v46 = vxor.u32 2147483648, %v681_v44 }
  0x61   :  { %v125_v5 = vxor.u32 2147483648, %v683_v45 }
  0x62   :  { %v129_v48 = vsel %vm127_vm2, %v128_v46, %v683_v45  ;;  %v232_v35 = vsel %vm230_vm3, %v128_v46, %v683_v45 }
  0x63   :  { %v126_v50 = vsel %vm124_vm4, %v681_v44, %v125_v5  ;;  %v229_v51 = vsel %vm227_vm5, %v681_v44, %v125_v5 }
  0x64   :  { %v130_v52 = vsel %vm123_vm6, %v126_v50, %v129_v48  ;;  %v233_v53 = vsel %vm226_vm7, %v229_v51, %v232_v35 }
  0x65   :  { %v131_v54 = vsel %vm120_vm8, nan, %v130_v52  ;;  %v234_v55 = vsel %vm120_vm8, nan, %v233_v53 }
  0x66   :  { %v842_v56 = vmul.f32 %v131_v54, %v131_v54  ;;  %v447_v57 = vmul.f32 0.8660254, %v234_v55  ;;  %v844_v58 = vmul.f32 %v234_v55, %v234_v55  ;;  %v461_v1 = vmul.f32 %v234_v55, %v131_v54  ;;  %v685_v59 = vpop.eup %684 }
  0x67   :  { %v518_v23 = vmul.f32 3.0, %v234_v55  ;;  %v687_v0 = vpop.eup %686  ;;  %v335_v4 = vxor.u32 2147483648, %v685_v59 }
  0x68   :  { %450 = vst [vmem:[#allocation5 + $0x10] sm:$0xff] %v447_v57  ;;  %v472_v60 = vmul.f32 2.0, %v844_v58  ;;  %v848_v61 = vmul.f32 %v842_v56, %v131_v54  ;;  %v505_v62 = vmul.f32 %v842_v56, %v234_v55  ;;  %v498_v63 = vmul.f32 4.0, %v844_v58 }
  0x69   :  { %v489_v6 = vmul.f32 %v844_v58, %v234_v55  ;;  %v519_v9 = vmul.f32 %v518_v23, %v842_v56  ;;  %v856_v10 = vmul.f32 %v842_v56, %v842_v56  ;;  %v332_v11 = vxor.u32 2147483648, %v687_v0 }
  0x6a   :  { %v473_v12 = vsub.f32 %v472_v60, %v842_v56  ;;  %v499_v13 = vsub.f32 %v498_v63, %v842_v56  ;;  %v861_v14 = vmul.f32 %v848_v61, %v234_v55  ;;  %v336_v15 = vsel %vm334_vm15, %v335_v4, %v687_v0 }
  0x6b   :  { %v439_v7 = vsel %vm437_vm12, %v335_v4, %v687_v0  ;;  %v517_v8 = vmul.f32 2.0, %v489_v6  ;;  %v545_v16 = vmul.f32 7.0, %v844_v58  ;;  %v333_v17 = vsel %vm331_vm14, %v685_v59, %v332_v11 }
  0x6c   :  { %v436_v18 = vsel %vm434_vm11, %v685_v59, %v332_v11  ;;  %v474_v19 = vmul.f32 0.559017, %v473_v12  ;;  %v511_v20 = vmul.f32 %v499_v13, %v131_v54  ;;  %v337_v24 = vsel %vm330_vm13, %v333_v17, %v336_v15 }
  0x6d   :  { %v440_v25 = vsel %vm433_vm10, %v436_v18, %v439_v7  ;;  %v520_v26 = vsub.f32 %v517_v8, %v519_v9  ;;  %v870_v22 = vadd.f32 -1.0, %v545_v16  ;;  %v338_v27 = vsel %vm327_vm9, nan, %v337_v24 }
  0x6e   :  { %v441_v21 = vsel %vm327_vm9, nan, %v440_v25  ;;  %477 = vst [vmem:[#allocation5 + $0x30] sm:$0xff] %v474_v19  ;;  %v660_v28 = vadd.f32 -3.0, %v545_v16  ;;  %v541_v29 = vmul.f32 %v844_v58, %v844_v58  ;;  %v442_v30 = vmul.f32 %v338_v27, %v131_v54 }
  0x6f   :  { %v443_v31 = vmul.f32 %v441_v21, %v131_v54  ;;  %v459_v32 = vmul.f32 %v441_v21, %v338_v27  ;;  %v467_v33 = vmul.f32 %v461_v1, %v338_v27  ;;  %v478_v34 = vmul.f32 %v461_v1, %v441_v21 }
  0x70   :  { %v878_v36 = vmul.f32 %v338_v27, %v338_v27  ;;  %v880_v37 = vmul.f32 %v441_v21, %v441_v21  ;;  %v512_v3 = vmul.f32 %v511_v20, %v338_v27  ;;  %v444_v38 = vmul.f32 0.8660254, %v442_v30 }
  0x71   :  { %v451_v39 = vmul.f32 0.8660254, %v443_v31  ;;  %v462_v2 = vmul.f32 %v459_v32, %v842_v56  ;;  %v468_v40 = vmul.f32 1.9364917, %v467_v33  ;;  %v479_v41 = vmul.f32 1.9364917, %v478_v34 }
  0x72   :  { %v460_v42 = vsub.f32 %v880_v37, %v878_v36  ;;  %v490_v43 = vmul.f32 %v878_v36, %v338_v27  ;;  %v492_v44 = vmul.f32 3.0, %v880_v37  ;;  %446 = vst [vmem:[#allocation5 + $0x8] sm:$0xff] %v444_v38  ;;  %v506_v46 = vmul.f32 %v505_v62, %v459_v32 }
  0x73   :  { %454 = vst [vmem:[#allocation5 + $0x18] sm:$0xff] %v451_v39  ;;  %v463_v45 = vmul.f32 1.9364917, %v462_v2  ;;  %471 = vst [vmem:[#allocation5 + $0x28] sm:$0xff] %v468_v40  ;;  %v513_v47 = vmul.f32 0.81009257, %v512_v3  ;;  %v525_v49 = vmul.f32 %v511_v20, %v441_v21  ;;  %v491_v52 = vmul.f32 %v880_v37, %v441_v21 }
  0x74   :  { %v521_v5 = vmul.f32 0.6614378, %v520_v26  ;;  %482 = vst [vmem:[#allocation5 + $0x38] sm:$0xff] %v479_v41  ;;  %v483_v48 = vmul.f32 %v460_v42, %v842_v56  ;;  %v493_v35 = vmul.f32 %v492_v44, %v338_v27  ;;  %v530_v50 = vmul.f32 %v505_v62, %v460_v42 }
  0x75   :  { %466 = vst [vmem:[#allocation5 + $0x20] sm:$0xff] %v463_v45  ;;  %v507_v51 = vmul.f32 5.1234756, %v506_v46  ;;  %516 = vst [vmem:[#allocation5 + $0x58] sm:$0xff] %v513_v47  ;;  %v495_v53 = vmul.f32 3.0, %v878_v36  ;;  %v548_v54 = vmul.f32 %v460_v42, %v459_v32  ;;  %v559_v60 = vmul.f32 %v870_v22, %v462_v2 }
  0x76   :  { %524 = vst [vmem:[#allocation5 + $0x60] sm:$0xff] %v521_v5  ;;  %v484_v55 = vmul.f32 0.96824586, %v483_v48  ;;  %v494_v57 = vsub.f32 %v493_v35, %v490_v43  ;;  %v526_v1 = vmul.f32 0.81009257, %v525_v49  ;;  %v564_v62 = vmul.f32 %v660_v28, %v467_v33 }
  0x77   :  { %v531_v23 = vmul.f32 2.5617378, %v530_v50  ;;  %510 = vst [vmem:[#allocation5 + $0x50] sm:$0xff] %v507_v51  ;;  %v496_v59 = vmul.f32 %v495_v53, %v441_v21  ;;  %v549_v56 = vmul.f32 %v548_v54, %v856_v10  ;;  %v569_v4 = vmul.f32 35.0, %v541_v29 }
  0x78   :  { %487 = vst [vmem:[#allocation5 + $0x40] sm:$0xff] %v484_v55  ;;  %v500_v63 = vmul.f32 %v494_v57, %v848_v61  ;;  %529 = vst [vmem:[#allocation5 + $0x68] sm:$0xff] %v526_v1  ;;  %v554_v0 = vmul.f32 %v861_v14, %v494_v57  ;;  %v570_v6 = vmul.f32 30.0, %v844_v58  ;;  %v560_v12 = vmul.f32 1.677051, %v559_v60 }
  0x79   :  { %534 = vst [vmem:[#allocation5 + $0x70] sm:$0xff] %v531_v23  ;;  %v497_v9 = vsub.f32 %v491_v52, %v496_v59  ;;  %v550_v11 = vmul.f32 4.43706, %v549_v56  ;;  %v565_v13 = vmul.f32 1.1858541, %v564_v62  ;;  %v577_v16 = vmul.f32 %v660_v28, %v478_v34 }
  0x7a   :  { %v501_v15 = vmul.f32 1.045825, %v500_v63  ;;  %v555_v7 = vmul.f32 3.137475, %v554_v0  ;;  %v571_v8 = vsub.f32 %v569_v4, %v570_v6  ;;  %563 = vst [vmem:[#allocation5 + $0x90] sm:$0xff] %v560_v12  ;;  %v582_v18 = vmul.f32 %v870_v22, %v483_v48 }
  0x7b   :  { %v535_v17 = vmul.f32 %v497_v9, %v848_v61  ;;  %553 = vst [vmem:[#allocation5 + $0x80] sm:$0xff] %v550_v11  ;;  %568 = vst [vmem:[#allocation5 + $0x98] sm:$0xff] %v565_v13  ;;  %v587_v19 = vmul.f32 %v861_v14, %v497_v9  ;;  %v578_v20 = vmul.f32 1.1858541, %v577_v16  ;;  %v543_v24 = vmul.f32 %v880_v37, %v880_v37 }
  0x7c   :  { %504 = vst [vmem:[#allocation5 + $0x48] sm:$0xff] %v501_v15  ;;  %558 = vst [vmem:[#allocation5 + $0x88] sm:$0xff] %v555_v7  ;;  %v572_v58 = vadd.f32 3.0, %v571_v8  ;;  %v592_v25 = vmul.f32 6.0, %v880_v37  ;;  %v583_v27 = vmul.f32 0.8385255, %v582_v18  ;;  %v542_v28 = vmul.f32 %v878_v36, %v878_v36 }
  0x7d   :  { %v536_v26 = vmul.f32 1.045825, %v535_v17  ;;  %v588_v21 = vmul.f32 3.137475, %v587_v19  ;;  %581 = vst [vmem:[#allocation5 + $0xa8] sm:$0xff] %v578_v20 }
  0x7e   :  { %v573_v61 = vmul.f32 0.1875, %v572_v58  ;;  %v593_v22 = vmul.f32 %v592_v25, %v878_v36  ;;  %586 = vst [vmem:[#allocation5 + $0xb0] sm:$0xff] %v583_v27 }
  0x7f   :  { %539 = vst [vmem:[#allocation5 + $0x78] sm:$0xff] %v536_v26  ;;  %591 = vst [vmem:[#allocation5 + $0xb8] sm:$0xff] %v588_v21 }
  0x80   :  { %576 = vst [vmem:[#allocation5 + $0xa0] sm:$0xff] %v573_v61  ;;  %v594_v14 = vsub.f32 %v543_v24, %v593_v22 }
  0x82   :  { %v595_v29 = vadd.f32 %v594_v14, %v542_v28 }
  0x84   :  { %v596_v30 = vmul.f32 %v595_v29, %v856_v10 }
  0x86   :  { %v597_v31 = vmul.f32 1.109265, %v596_v30 }
  0x88   :  { %600 = vst [vmem:[#allocation5 + $0xc0] sm:$0xff] %v597_v31 }
  0x89   :  { %721 = shalt.err (!%p718_p12)
}
  0x8a   :  { %s722_s24 = scalar_lea.hbm %s921_s1, 3200 }
  0x8b   :  { %p723_p13 = scmp.ne.s32.totalorder %s921_s1, %s722_s24  ;;  %p726_p0 = scmp.lt.u32.totalorder %s722_s24, %s921_s1 }
  0x8d   :  { %p728_p1 = pnand %p726_p0, %p723_p13 }
  0x8f   :  { %731 = shalt.err (!%p728_p1)
}
  0x90   :  { %612 = dma.vmem_to_hbm [thread:$0]  %s607_s20, 3200, %s921_s1, [#allocation4], %s737_s16, %s737_s16, %s738_s17  }
  0x91   :  { %734 = dma.done.wait [#allocation4], 3200  }
  0x92   :  { %735 = vsyncadd [#allocation4], 4294964096 }
  0x93   :  { %616 = vsyncpa [#allocation3], 1 }
  0x94   :  { %617 = vsyncpa [#allocation4], 1 }

</bundles_post_ra>
